<compile_context>
chip_gen: v7x
topology: tpu7x:2x2x1
jax: 0.10.0
libtpu: 0.0.40
codegen_flags: <defaults>
</compile_context>

<pallas_src>
import jax
import jax.numpy as jnp
import numpy as np
from jax import lax
from jax.experimental import pallas as pl
from jax.experimental.pallas import tpu as pltpu


def _make_kernel(Cin, Cout, Cr, HW, apply_residual):

    def kernel(x_ref, wc_ref, sc_ref, bi_ref, f1_ref, f2_ref, o_ref):
        x = x_ref[...]                                            # (Cin, HW) f32

        # ---- 1x1 conv as a single MXU matmul (bf16 in, f32 accumulate) ----
        y = jnp.dot(wc_ref[...].astype(jnp.bfloat16),
                    x.astype(jnp.bfloat16),
                    preferred_element_type=jnp.float32)           # (Cout, HW)

        # ---- BatchNorm (eval mode, folded per-channel scale/bias) ----
        y = y * sc_ref[...] + bi_ref[...]                         # (Cout, HW)

        # ---- Channel attention (avg-pool & max-pool stacked into one MLP) ----
        avg = jnp.mean(y, axis=-1, keepdims=True)                 # (Cout, 1)
        mx = jnp.max(y, axis=-1, keepdims=True)                   # (Cout, 1)
        col = lax.broadcasted_iota(jnp.int32, (Cout, 2), 1)
        pooled = jnp.where(col == 0, avg, mx)                     # (Cout, 2) = [avg | max]
        h = jnp.maximum(
            jnp.dot(f1_ref[...], pooled, preferred_element_type=jnp.float32),
            0.0)                                                  # (Cr, 2)
        m = jnp.dot(f2_ref[...], h, preferred_element_type=jnp.float32)  # (Cout, 2)
        # sum of the two columns == mlp(avg) + mlp(max)
        ca = jax.nn.sigmoid(jnp.sum(m, axis=-1, keepdims=True))   # (Cout, 1)
        out = y * ca

        # ---- residual + ReLU (only when inplanes == planes) ----
        if apply_residual:
            out = jnp.maximum(x + out, 0.0)
        o_ref[...] = out

    return kernel


def fc_forward(x_nchw, params):
    """Fused FC forward. Input/output are NCHW (PyTorch convention)."""
    w_conv, bn_scale, bn_bias, fc1_w, fc2_w = params
    N, Cin, H, W = x_nchw.shape
    Cout, _ = w_conv.shape
    Cr = fc1_w.shape[0]
    HW = H * W
    apply_residual = (Cin == Cout)

    x = x_nchw.reshape(N, Cin, HW).astype(jnp.float32)

    kernel = _make_kernel(Cin, Cout, Cr, HW, apply_residual)

    out = pl.pallas_call(
        kernel,
        out_shape=jax.ShapeDtypeStruct((N, Cout, HW), jnp.float32),
        grid=(N,),
        in_specs=[
            pl.BlockSpec((None, Cin, HW), lambda n: (n, 0, 0)),   # activations
            pl.BlockSpec((Cout, Cin), lambda n: (0, 0)),          # 1x1 conv weight
            pl.BlockSpec((Cout, 1), lambda n: (0, 0)),            # folded BN scale
            pl.BlockSpec((Cout, 1), lambda n: (0, 0)),            # folded BN bias
            pl.BlockSpec((Cr, Cout), lambda n: (0, 0)),           # fc1 (1x1 conv) weight
            pl.BlockSpec((Cout, Cr), lambda n: (0, 0)),           # fc2 (1x1 conv) weight
        ],
        out_specs=pl.BlockSpec((None, Cout, HW), lambda n: (n, 0, 0)),
        compiler_params=pltpu.CompilerParams(dimension_semantics=("parallel",)),
    )(x, w_conv, bn_scale.reshape(Cout, 1), bn_bias.reshape(Cout, 1),
      fc1_w, fc2_w)

    return out.reshape(N, Cout, H, W)


def reference_forward(x_nchw, params):
    """Pure-JAX reference of the same forward pass (for correctness checking)."""
    w_conv, bn_scale, bn_bias, fc1_w, fc2_w = params
    N, Cin, H, W = x_nchw.shape
    Cout = w_conv.shape[0]
    hp = lax.Precision.HIGHEST
    x = x_nchw.astype(jnp.float32)

    y = jnp.einsum('oi,nihw->nohw', w_conv, x, precision=hp)
    y = y * bn_scale[None, :, None, None] + bn_bias[None, :, None, None]

    avg = jnp.mean(y, axis=(2, 3))                                # (N, Cout)
    mx = jnp.max(y, axis=(2, 3))                                  # (N, Cout)

    def mlp(v):
        h = jnp.maximum(jnp.einsum('rc,nc->nr', fc1_w, v, precision=hp), 0.0)
        return jnp.einsum('cr,nr->nc', fc2_w, h, precision=hp)

    ca = jax.nn.sigmoid(mlp(avg) + mlp(mx))
    out = y * ca[:, :, None, None]
    if Cin == Cout:
        out = jnp.maximum(x + out, 0.0)
    return out


def init_params(key, Cin, Cout, ratio=16):
    Cr = max(Cout // ratio, 1)
    ks = jax.random.split(key, 7)
    w_conv = jax.random.normal(ks[0], (Cout, Cin), jnp.float32) * 0.1   # 1x1 conv (out, in)
    gamma = jax.random.uniform(ks[1], (Cout,), jnp.float32, 0.8, 1.2)
    beta = jax.random.normal(ks[2], (Cout,), jnp.float32) * 0.1
    run_mean = jax.random.normal(ks[3], (Cout,), jnp.float32) * 0.1
    run_var = jax.random.uniform(ks[4], (Cout,), jnp.float32, 0.8, 1.2)
    eps = 1e-5
    bn_scale = gamma / jnp.sqrt(run_var + eps)
    bn_bias = beta - run_mean * bn_scale
    fc1_w = jax.random.normal(ks[5], (Cr, Cout), jnp.float32) * 0.3     # 1x1 conv C -> C/r
    fc2_w = jax.random.normal(ks[6], (Cout, Cr), jnp.float32) * 0.3     # 1x1 conv C/r -> C
    return (w_conv, bn_scale, bn_bias, fc1_w, fc2_w)


if __name__ == "__main__":
    N, C, H, W = 2, 32, 16, 16            # inplanes = planes = 32, ratio=16 -> hidden=2
    key = jax.random.PRNGKey(0)
    kx, kp = jax.random.split(key)
    x = jax.random.normal(kx, (N, C, H, W), jnp.float32)
    params = init_params(kp, C, C)

    out = jax.block_until_ready(fc_forward(x, params))
    ref = jax.block_until_ready(reference_forward(x, params))

    np.testing.assert_allclose(np.asarray(out), np.asarray(ref), rtol=2e-2, atol=2e-2)
    print("KERNEL_OK")
</pallas_src>

<mosaic_0001>
module attributes {stable_mosaic.version = 11 : i64} {
  func.func @kernel(%arg0: i32, %arg1: memref<1x32x256xf32, #tpu.memory_space<vmem>>, %arg2: memref<32x32xf32, #tpu.memory_space<vmem>>, %arg3: memref<32x1xf32, #tpu.memory_space<vmem>>, %arg4: memref<32x1xf32, #tpu.memory_space<vmem>>, %arg5: memref<2x32xf32, #tpu.memory_space<vmem>>, %arg6: memref<32x2xf32, #tpu.memory_space<vmem>>, %arg7: memref<1x32x256xf32, #tpu.memory_space<vmem>>) attributes {dimension_semantics = [#tpu.dimension_semantics<parallel>], iteration_bounds = array<i64: 2>, scalar_prefetch = 0 : i64, scratch_operands = 0 : i64, tpu.core_type = #tpu.core_type<tc>, window_params = [{transform_indices = @transform_0, window_bounds = array<i64: 1, 32, 256>}, {pipeline_mode = #tpu.pipeline_mode<synchronous>, transform_indices = @transform_1, window_bounds = array<i64: 32, 32>}, {pipeline_mode = #tpu.pipeline_mode<synchronous>, transform_indices = @transform_2, window_bounds = array<i64: 32, 1>}, {pipeline_mode = #tpu.pipeline_mode<synchronous>, transform_indices = @transform_3, window_bounds = array<i64: 32, 1>}, {pipeline_mode = #tpu.pipeline_mode<synchronous>, transform_indices = @transform_4, window_bounds = array<i64: 2, 32>}, {pipeline_mode = #tpu.pipeline_mode<synchronous>, transform_indices = @transform_5, window_bounds = array<i64: 32, 2>}, {transform_indices = @transform_6, window_bounds = array<i64: 1, 32, 256>}]} {
    %c0 = arith.constant 0 : index
    %c0_0 = arith.constant 0 : index
    %c0_1 = arith.constant 0 : index
    %0 = vector.load %arg1[%c0, %c0_0, %c0_1] : memref<1x32x256xf32, #tpu.memory_space<vmem>>, vector<1x32x256xf32>
    %1 = vector.shape_cast %0 : vector<1x32x256xf32> to vector<32x256xf32>
    %c0_2 = arith.constant 0 : index
    %c0_3 = arith.constant 0 : index
    %2 = vector.load %arg2[%c0_2, %c0_3] : memref<32x32xf32, #tpu.memory_space<vmem>>, vector<32x32xf32>
    %3 = arith.truncf %2 : vector<32x32xf32> to vector<32x32xbf16>
    %4 = arith.truncf %1 : vector<32x256xf32> to vector<32x256xbf16>
    %cst = arith.constant dense<0.000000e+00> : vector<32x256xf32>
    %5 = tpu.matmul %3, %4, %cst {dimension_numbers = #tpu.dot_dimension_numbers<[1], [0], [0], [1], [0, 0, 1, 1], [], []>} : vector<32x32xbf16>, vector<32x256xbf16>, vector<32x256xf32> -> vector<32x256xf32>
    %c0_4 = arith.constant 0 : index
    %c0_5 = arith.constant 0 : index
    %6 = vector.load %arg3[%c0_4, %c0_5] : memref<32x1xf32, #tpu.memory_space<vmem>>, vector<32x1xf32>
    %7 = vector.broadcast %6 : vector<32x1xf32> to vector<32x256xf32>
    %8 = arith.mulf %5, %7 : vector<32x256xf32>
    %c0_6 = arith.constant 0 : index
    %c0_7 = arith.constant 0 : index
    %9 = vector.load %arg4[%c0_6, %c0_7] : memref<32x1xf32, #tpu.memory_space<vmem>>, vector<32x1xf32>
    %10 = vector.broadcast %9 : vector<32x1xf32> to vector<32x256xf32>
    %11 = arith.addf %8, %10 : vector<32x256xf32>
    %cst_8 = arith.constant dense<0.000000e+00> : vector<32xf32>
    %12 = vector.multi_reduction <add>, %11, %cst_8 [1] : vector<32x256xf32> to vector<32xf32>
    %13 = vector.shape_cast %12 : vector<32xf32> to vector<32x1xf32>
    %cst_9 = arith.constant 2.560000e+02 : f32
    %14 = vector.broadcast %cst_9 : f32 to vector<32x1xf32>
    %15 = arith.divf %13, %14 : vector<32x1xf32>
    %cst_10 = arith.constant dense<0xFF800000> : vector<32xf32>
    %16 = vector.multi_reduction <maximumf>, %11, %cst_10 [1] : vector<32x256xf32> to vector<32xf32>
    %17 = vector.shape_cast %16 : vector<32xf32> to vector<32x1xf32>
    %18 = tpu.iota {dimensions = array<i32: 1>} : vector<32x2xi32>
    %c0_i32 = arith.constant 0 : i32
    %19 = vector.broadcast %c0_i32 : i32 to vector<32x2xi32>
    %20 = arith.cmpi eq, %18, %19 : vector<32x2xi32>
    %21 = vector.shape_cast %15 : vector<32x1xf32> to vector<32x1xf32>
    %22 = vector.broadcast %21 : vector<32x1xf32> to vector<32x2xf32>
    %23 = vector.shape_cast %17 : vector<32x1xf32> to vector<32x1xf32>
    %24 = vector.broadcast %23 : vector<32x1xf32> to vector<32x2xf32>
    %25 = arith.select %20, %22, %24 : vector<32x2xi1>, vector<32x2xf32>
    %c0_11 = arith.constant 0 : index
    %c0_12 = arith.constant 0 : index
    %26 = vector.load %arg5[%c0_11, %c0_12] : memref<2x32xf32, #tpu.memory_space<vmem>>, vector<2x32xf32>
    %cst_13 = arith.constant dense<0.000000e+00> : vector<2x2xf32>
    %27 = tpu.matmul %26, %25, %cst_13 {dimension_numbers = #tpu.dot_dimension_numbers<[1], [0], [0], [1], [0, 0, 1, 1], [], []>} : vector<2x32xf32>, vector<32x2xf32>, vector<2x2xf32> -> vector<2x2xf32>
    %cst_14 = arith.constant 0.000000e+00 : f32
    %28 = vector.broadcast %cst_14 : f32 to vector<2x2xf32>
    %29 = arith.maximumf %27, %28 : vector<2x2xf32>
    %c0_15 = arith.constant 0 : index
    %c0_16 = arith.constant 0 : index
    %30 = vector.load %arg6[%c0_15, %c0_16] : memref<32x2xf32, #tpu.memory_space<vmem>>, vector<32x2xf32>
    %cst_17 = arith.constant dense<0.000000e+00> : vector<32x2xf32>
    %31 = tpu.matmul %30, %29, %cst_17 {dimension_numbers = #tpu.dot_dimension_numbers<[1], [0], [0], [1], [0, 0, 1, 1], [], []>} : vector<32x2xf32>, vector<2x2xf32>, vector<32x2xf32> -> vector<32x2xf32>
    %cst_18 = arith.constant dense<0.000000e+00> : vector<32xf32>
    %32 = vector.multi_reduction <add>, %31, %cst_18 [1] : vector<32x2xf32> to vector<32xf32>
    %33 = vector.shape_cast %32 : vector<32xf32> to vector<32x1xf32>
    %34 = arith.negf %33 : vector<32x1xf32>
    %35 = math.exp %34 : vector<32x1xf32>
    %cst_19 = arith.constant 1.000000e+00 : f32
    %36 = vector.broadcast %cst_19 : f32 to vector<32x1xf32>
    %37 = arith.addf %36, %35 : vector<32x1xf32>
    %38 = arith.divf %36, %37 : vector<32x1xf32>
    %39 = vector.broadcast %38 : vector<32x1xf32> to vector<32x256xf32>
    %40 = arith.mulf %11, %39 : vector<32x256xf32>
    %41 = arith.addf %1, %40 : vector<32x256xf32>
    %cst_20 = arith.constant 0.000000e+00 : f32
    %42 = vector.broadcast %cst_20 : f32 to vector<32x256xf32>
    %43 = arith.maximumf %41, %42 : vector<32x256xf32>
    %c0_21 = arith.constant 0 : index
    %c0_22 = arith.constant 0 : index
    %c0_23 = arith.constant 0 : index
    %44 = vector.load %arg7[%c0_21, %c0_22, %c0_23] : memref<1x32x256xf32, #tpu.memory_space<vmem>>, vector<1x32x256xf32>
    %45 = vector.shape_cast %44 : vector<1x32x256xf32> to vector<32x256xf32>
    %46 = vector.shape_cast %43 : vector<32x256xf32> to vector<1x32x256xf32>
    tpu.vector_store %arg7[%c0_21, %c0_22, %c0_23], %46 {strides = array<i32>} : memref<1x32x256xf32, #tpu.memory_space<vmem>>, vector<1x32x256xf32>,
    return
  }
  func.func @transform_0(%arg0: i32) -> (i32, i32, i32) {
    %c0_i32 = arith.constant 0 : i32
    %c0_i32_0 = arith.constant 0 : i32
    %c0_i32_1 = arith.constant 0 : i32
    return %arg0, %c0_i32, %c0_i32_0 : i32, i32, i32
  }
  func.func @transform_1(%arg0: i32) -> (i32, i32) {
    %c0_i32 = arith.constant 0 : i32
    %c0_i32_0 = arith.constant 0 : i32
    %c0_i32_1 = arith.constant 0 : i32
    return %c0_i32, %c0_i32_0 : i32, i32
  }
  func.func @transform_2(%arg0: i32) -> (i32, i32) {
    %c0_i32 = arith.constant 0 : i32
    %c0_i32_0 = arith.constant 0 : i32
    %c0_i32_1 = arith.constant 0 : i32
    return %c0_i32, %c0_i32_0 : i32, i32
  }
  func.func @transform_3(%arg0: i32) -> (i32, i32) {
    %c0_i32 = arith.constant 0 : i32
    %c0_i32_0 = arith.constant 0 : i32
    %c0_i32_1 = arith.constant 0 : i32
    return %c0_i32, %c0_i32_0 : i32, i32
  }
  func.func @transform_4(%arg0: i32) -> (i32, i32) {
    %c0_i32 = arith.constant 0 : i32
    %c0_i32_0 = arith.constant 0 : i32
    %c0_i32_1 = arith.constant 0 : i32
    return %c0_i32, %c0_i32_0 : i32, i32
  }
  func.func @transform_5(%arg0: i32) -> (i32, i32) {
    %c0_i32 = arith.constant 0 : i32
    %c0_i32_0 = arith.constant 0 : i32
    %c0_i32_1 = arith.constant 0 : i32
    return %c0_i32, %c0_i32_0 : i32, i32
  }
  func.func @transform_6(%arg0: i32) -> (i32, i32, i32) {
    %c0_i32 = arith.constant 0 : i32
    %c0_i32_0 = arith.constant 0 : i32
    %c0_i32_1 = arith.constant 0 : i32
    return %arg0, %c0_i32, %c0_i32_0 : i32, i32, i32
  }
}

</mosaic_0001>

<bundles_post_ra>
// kernel: tpu_custom_call.1
= control target key start
LH: loop header
LB: loop body
LE: loop exit
PB: predicated region body
PF: predicated region fallthrough
CT: control target
= control target key end

     0   :  { %11 = vsyncpa [#allocation3], 0  ;;  %s1367_s0 = inlined_call_operand.hbm [shape: f32[2,32,256], index: 0, kind: input, shape index: {}]   ;;  %s1368_s1 = inlined_call_operand.vmem [shape: f32[32,32], index: 1, kind: input, shape index: {}]   ;;  %s1369_s2 = inlined_call_operand.vmem [shape: f32[32,1], index: 2, kind: input, shape index: {}]   ;;  %s1370_s3 = inlined_call_operand.vmem [shape: f32[32,1], index: 3, kind: input, shape index: {}]   ;;  %s1371_s4 = inlined_call_operand.vmem [shape: f32[2,32], index: 4, kind: input, shape index: {}]   ;;  %s1372_s5 = inlined_call_operand.vmem [shape: f32[32,2], index: 5, kind: input, shape index: {}]   ;;  %s1373_s6 = inlined_call_operand.hbm [shape: f32[2,32,256], index: 6, kind: output, shape index: {}]  }
   0x1   :  { %13 = vsyncpa [#allocation3 + $0x1], 0 }
   0x2   :  { %14 = vsyncpa [#allocation4], 0 }
   0x3   :  { %16 = vsyncpa [#allocation4 + $0x1], 0  ;;  %s1063_s21 = smov 0   ;;  %s1065_s22 = smov 0  }
   0x4   :  { %s1067_s23 = smov 0   ;;  %s1069_s24 = smov 0  }
   0x5 LB: > { %s1084_s25 = sadd.s32 4294967295, %s1016_s24   ;;  %s785_s26 = sadd.s32 4294967294, %s1016_s24   ;;  %s1016_s24 = sphi %s1069_s24, %s1386_s24   ;;  %s1012_s23 = sphi %s1067_s23, %s1385_s23   ;;  %s1008_s22 = sphi %s1065_s22, %s1384_s22   ;;  %s1004_s21 = sphi %s1063_s21, %s1383_s21  }
   0x6   : > { %s1088_s27 = sadd.s32 1, %s1016_s24   ;;  %s29_s28 = sadd.s32 1, %s1012_s23 }
   0x7   : > { %s26_s29 = ssub.s32 %s1016_s24, %s1088_s27  ;;  %p36_p0 = scmp.ne.s32.totalorder %s1012_s23, %s1008_s22 }
   0x8   : > { %p27_p1 = scmp.eq.s32.totalorder %s26_s29, 0  ;;  %p37_p2 = scmp.eq.s32.totalorder %s1016_s24, 0 }
   0x9   : > { %p42_p3 = scmp.ne.s32.totalorder %s1008_s22, %s1004_s21  ;;  %p43_p4 = scmp.eq.s32.totalorder %s1084_s25, 0 }
   0xa   : > { %s1100_s30 = scalar_select %p27_p1, %s1012_s23, %s29_s28  }
   0xb   : > { %p1102_p5 = por %p37_p2, %p36_p0  ;;  %p1106_p6 = por %p43_p4, %p42_p3 }
   0xc   : > { %p171_p7 = scmp.eq.s32.totalorder %s1084_s25, 1  ;;  %p177_p8 = scmp.eq.s32.totalorder %s785_s26, 1 }
   0xd   : > { %p860_p10 = scmp.lt.s32.totalorder %s1016_s24, 2  ;;  %s212_s11 = sand.u32 1, %s1012_s23  }
   0xe   : > { %p1113_p11 = por %p171_p7, %p36_p0  ;;  %p1117_p12 = por %p177_p8, %p42_p3 }
   0xf   : > { %s811_s12 = sshll.u32 %s1016_s24, 10  ;;  %s788_s13 = sshll.u32 %s212_s11, 6 }
  0x10   : > { %s1377_s9 = scalar_select %p1113_p11, 1, 0 }
  0x11   : > { %s1378_s10 = scalar_select %p1117_p12, 1, 0 }
  0x12   : > { %s1126_s16 = scalar_lea.hbm %s1367_s0, %s811_s12  ;;  %s216_s17 = scalar_lea.vmem [#allocation2], %s788_s13 }
  0x13   : > { %s223_s18 = sshll.u32 %s216_s17, 4  ;;  %p1130_p13 = pnand %p860_p10, %p1102_p5  ;;  %s1134_s18 = int_to_ptr.vmem [resolvable:$true] %s223_s18 }
  0x14   : > { %s1136_s20 = scalar_lea.sflag [#allocation3], %s212_s11  ;;  %s920_s26 = scalar_lea.hbm %s1126_s16, 1024 }
  0x15   : > { %p921_p0 = scmp.ne.s32.totalorder %s1126_s16, %s920_s26  ;;  %p922_p1 = pneg %p1130_p13 }
  0x16   : > { %s925_s7 = scalar_lea.hbm %s1367_s0, 2048  ;;  %p926_p4 = scmp.lt.u32.totalorder %s1126_s16, %s1367_s0 }
  0x17   : > { %p923_p2 = pnand %p922_p1, %p921_p0  ;;  %p927_p5 = scmp.lt.u32.totalorder %s925_s7, %s920_s26 }
  0x18   : > { %p929_p8 = scmp.lt.u32.totalorder %s920_s26, %s1126_s16 }
  0x19   : > { %p924_p3 = pneg %p923_p2  ;;  %p928_p7 = por %p927_p5, %p926_p4 }
  0x1b   : > { %p930_p10 = por %p929_p8, %p928_p7 }
  0x1d   : > { %p931_p9 = pnand %p930_p10, %p924_p3 }
  0x1f   : > { %934 = shalt.err (!%p931_p9)
}
  0x20   : > { %s935_s11 = scalar_lea.vmem %s1134_s18, 1024  ;;  %s1018_s14 = smov [#allocation2]  }
  0x21   : > { %p936_p0 = scmp.ne.s32.totalorder %s1134_s18, %s935_s11  ;;  %s940_s15 = sshll.u32 %s1018_s14, 4  ;;  %s941_s15 = int_to_ptr.vmem [resolvable:$false] %s940_s15 }
  0x22   : > { %s942_s17 = scalar_lea.vmem %s941_s15, 2048  ;;  %p943_p11 = scmp.lt.s32.totalorder %s1134_s18, %s941_s15 }
  0x23   : > { %p938_p2 = pnand %p936_p0, %p922_p1  ;;  %p944_p4 = scmp.lt.s32.totalorder %s942_s17, %s935_s11 }
  0x25   : > { %p939_p12 = pneg %p938_p2  ;;  %p945_p5 = por %p944_p4, %p943_p11 }
  0x27   : > { %p946_p7 = pnand %p945_p5, %p939_p12 }
  0x29   : > { %949 = shalt.err (!%p946_p7)
}
  0x2a   : > { %s1019_s26 = smov 256   ;;  %s1020_s28 = smov 16  }
  0x2b   : > { %855 = dma.hbm_to_vmem [thread:$0]  (!%p1130_p13), %s1126_s16, 1024, %s1134_s18, %s1136_s20, %s1019_s26, %s1019_s26, %s1020_s28  }
  0x2c   : > { %p791_p9 = scmp.ge.s32.totalorder %s1016_s24, 1  ;;  %p231_p1 = scmp.lt.s32.totalorder %s1016_s24, 3 }
  0x2e   : > { %p232_p3 = pnand %p791_p9, %p231_p1 }
  0x2f   : > { %s1167_s29 = sand.u32 (!%p232_p3), 1, %s1008_s22  }
  0x30   : > { %235 = sbr.rel (%p232_p3) target bundleno = 1073 (0x431), region = 44  ;;  %s792_s7 = sshll.u32 (!%p232_p3), %s1167_s29, 6 }
  0x31   : > { %s238_s12 = scalar_lea.sflag (!%p232_p3), [#allocation3], %s1167_s29  ;;  %s241_s13 = scalar_lea.vmem (!%p232_p3), [#allocation2], %s792_s7 }
  0x37   : > { %995 = dma.done.wait (%p1106_p6), %s238_s12, 1024  }
  0x38   : > { %997 = vsyncadd (%p1106_p6), %s238_s12, 4294966272  ;;  %v1021_v0 = vmov 0   ;;  %v1177_v1 = vld [vmem:[%s241_s13 + $0x8] sm:$0xff]  ;;  %v1179_v2 = vld [vmem:[%s241_s13 + $0x18] sm:$0xff]  ;;  %vm289_vm0 = vcmask 261120   ;;  %vm1023_vm1 = vmmov 0  }
  0x39   : > { %328 = vmatprep.mubr.bf16.mxu0 %v1021_v0  ;;  %902 = vset.pattern.permute.xlu0 %v1021_v0  ;;  %v1181_v3 = vld [vmem:[%s241_s13] sm:$0xff]  ;;  %v286_v4 = vpack.c.bf16 %v1179_v2, %v1177_v1  ;;  %v1185_v5 = vld [vmem:[%s241_s13 + $0x10] sm:$0xff]  ;;  %v1187_v6 = vld [vmem:[%s241_s13 + $0x28] sm:$0xff]  ;;  %vm528_vm3 = vcmask 15360   ;;  %vm541_vm4 = vcmask 1041408   ;;  %s812_s17 = sshll.u32 %s1084_s25, 10 }
  0x3a   : > { %903 = vset.pattern.permute.xlu1 %v1021_v0  ;;  %v1189_v7 = vld [vmem:[%s241_s13 + $0x38] sm:$0xff]  ;;  %v285_v8 = vpack.c.bf16 %v1185_v5, %v1181_v3  ;;  %v1195_v10 = vld [vmem:[%s241_s13 + $0x20] sm:$0xff]  ;;  %v1197_v11 = vld [vmem:[%s241_s13 + $0x30] sm:$0xff]  ;;  %s269_s26 = scalar_lea.vmem [#allocation5], %s792_s7  ;;  %s1321_s7 = scalar_lea.hbm %s1373_s6, %s812_s17 }
  0x3b   : > { %v288_v9 = vpack.c.bf16 %v1189_v7, %v1187_v6  ;;  %296 = vmatprep.subr.bf16.mxu0 %v286_v4  ;;  %v279_v12 = vld [vmem:[%s1368_s1] sm:$0xff]  ;;  %v287_v13 = vpack.c.bf16 %v1197_v11, %v1195_v10  ;;  %v280_v14 = vld [vmem:[%s1368_s1 + $0x8] sm:$0xff]  ;;  %v351_v20 = vld [vmem:[%s1369_s2 + $0x10] sm:$0xff]  ;;  %s712_s28 = sshll.u32 %s269_s26, 4  ;;  %s699_s13 = scalar_lea.sflag [#allocation4], %s1167_s29  ;;  %s1323_s28 = int_to_ptr.vmem [resolvable:$true] %s712_s28 }
  0x3c   : > { %297 = vmatpush1.bf16.msra.mxu0 %v285_v8  ;;  %v349_v15 = vld [vmem:[%s1369_s2] sm:$0xff]  ;;  %v350_v17 = vld [vmem:[%s1369_s2 + $0x8] sm:$0xff]  ;;  %v283_v18 = vpack.c.bf16 %v280_v14, %v279_v12  ;;  %v352_v21 = vld [vmem:[%s1369_s2 + $0x18] sm:$0xff]  ;;  %v1024_v12 = vmov 0.0   ;;  %s950_s8 = scalar_lea.vmem %s1323_s28, 1024  ;;  %p1380_p11 = scmp.ne.s32.totalorder %s1377_s9, 0 }
  0x3d   : > { %v381_v16 = vld [vmem:[%s1370_s3] sm:$0xff]  ;;  %298 = vmatprep.subr.bf16.mxu0 %v288_v9  ;;  %355 = vperm.xlu0 %902, %v349_v15   ;;  %v382_v19 = vld [vmem:[%s1370_s3 + $0x8] sm:$0xff]  ;;  %v281_v22 = vld [vmem:[%s1368_s1 + $0x10] sm:$0xff]  ;;  %v1022_v9 = vmov 0.0|0.0   ;;  %p951_p6 = scmp.ne.s32.totalorder %s1323_s28, %s950_s8  ;;  %s1025_s16 = smov [#allocation5]  }
  0x3e   : > { %387 = vperm.xlu1 %903, %v381_v16   ;;  %v282_v23 = vld [vmem:[%s1368_s1 + $0x18] sm:$0xff]  ;;  %v383_v24 = vld [vmem:[%s1370_s3 + $0x10] sm:$0xff]  ;;  %842 = vmatprep.subr.bf16.mxu1 %v1022_v9  ;;  %s954_s18 = sshll.u32 %s1025_s16, 4  ;;  %s955_s18 = int_to_ptr.vmem [resolvable:$false] %s954_s18 }
  0x3f   : > { %v284_v25 = vpack.c.bf16 %v282_v23, %v281_v22  ;;  %v384_v26 = vld [vmem:[%s1370_s3 + $0x18] sm:$0xff]  ;;  %831 = vmatprep.mubr.msk.f32.mxu1 %vm1023_vm1, %v1024_v12  ;;  %p952_p12 = pnand %p951_p6, %p1380_p11  ;;  %s956_s19 = scalar_lea.vmem %s955_s18, 2048 }
  0x40   : > { %299 = vmatpush1.bf16.msra.mxu0 %v287_v13  ;;  %v442_v13 = vlaneseq  ;;  %p957_p8 = scmp.lt.s32.totalorder %s1323_s28, %s955_s18  ;;  %p958_p10 = scmp.lt.s32.totalorder %s956_s19, %s950_s8 }
  0x41   : > { %360 = vperm.xlu0 %902, %v350_v17   ;;  %p953_p13 = pneg %p952_p12 }
  0x42   : > { %392 = vperm.xlu1 %903, %v382_v19   ;;  %v443_v15 = vand.u32 127, %v442_v13  ;;  %p959_p0 = por %p958_p10, %p957_p8 }
  0x43   : > { %794 = vmatmul.mubr.msk.bf16.vlgmr.msra.gmra.mrb[0].mxu0 %vm289_vm0, %v283_v18 }
  0x44   : > { %338 = vmatprep.mubr.bf16.mxu0 %v1021_v0  ;;  %vm444_vm2 = vcmp.eq.s32.totalorder %v443_v15, 0  ;;  %p960_p2 = pnand %p959_p0, %p953_p13 }
  0x45   : > { %365 = vperm.xlu0 %902, %v351_v20  }
  0x46   : > { %370 = vperm.xlu1 %903, %v352_v21  }
  0x49   : > { %397 = vperm.xlu0 %902, %v383_v24  }
  0x4a   : > { %402 = vperm.xlu1 %903, %v384_v26  }
  0x4b   : > { %795 = vmatmul.mubr.msk.bf16.gmra.mrb[4].mxu0 %vm289_vm0, %v284_v25 }
  0xbc   : > { %v356_v27 = vpop.permute.xlu0 %355 }
  0xbd   : > { %v388_v28 = vpop.permute.xlu1 %387 }
  0xc0   : > { %v361_v29 = vpop.permute.xlu0 %360 }
  0xc1   : > { %v393_v31 = vpop.permute.xlu1 %392 }
  0xc4   : > { %v366_v39 = vpop.permute.xlu0 %365 }
  0xc5   : > { %v371_v45 = vpop.permute.xlu1 %370 }
  0xc8   : > { %v398_v50 = vpop.permute.xlu0 %397 }
  0xc9   : > { %v403_v59 = vpop.permute.xlu1 %402 }
 0x116   : > { %v330_v30 = vpop.f32.mrb[0].mxu0 }
 0x117   : > { %v373_v32 = vmul.f32 %v356_v27, %v330_v30  ;;  %v332_v33 = vpop.f32.mrb[1].mxu0 }
 0x118   : > { %v374_v34 = vmul.f32 %v356_v27, %v332_v33  ;;  %v334_v35 = vpop.f32.mrb[2].mxu0  ;;  %v449_v33 = vld [vmem:[%s1371_s4] sm:$0x3] }
 0x119   : > { %v1239_v36 = vadd.f32 %v388_v28, %v373_v32  ;;  %v375_v37 = vmul.f32 %v361_v29, %v334_v35  ;;  %v336_v38 = vpop.f32.mrb[3].mxu0 }
 0x11a   : > { %v1241_v40 = vadd.f32 %v388_v28, %v374_v34  ;;  %v376_v41 = vmul.f32 %v361_v29, %v336_v38  ;;  %v524_v34 = vld [vmem:[%s1372_s5] sm:$0xff] }
 0x11b   : > { %v1243_v42 = vadd.f32 %v393_v31, %v375_v37 }
 0x11c   : > { %v1245_v43 = vadd.f32 %v393_v31, %v376_v41  ;;  %v413_v44 = vadd.f32 %v1241_v40, %v1239_v36  ;;  %v430_v53 = vmax.f32 %v1239_v36, %v1241_v40  ;;  %v526_v41 = vld [vmem:[%s1372_s5 + $0x10] sm:$0xff] }
 0x11e   : > { %414 = vadd.xlane.f32.xlu0 %v413_v44  ;;  %v340_v46 = vpop.f32.mrb[4].mxu0  ;;  %v416_v47 = vadd.f32 %v1245_v43, %v1243_v42  ;;  %v433_v62 = vmax.f32 %v1243_v42, %v1245_v43  ;;  %v527_v44 = vld [vmem:[%s1372_s5 + $0x18] sm:$0xff] }
 0x11f   : > { %v377_v48 = vmul.f32 %v366_v39, %v340_v46  ;;  %v342_v49 = vpop.f32.mrb[5].mxu0 }
 0x120   : > { %v378_v51 = vmul.f32 %v366_v39, %v342_v49  ;;  %417 = vadd.xlane.f32.xlu1 %v416_v47  ;;  %v344_v52 = vpop.f32.mrb[6].mxu0  ;;  %v525_v39 = vld [vmem:[%s1372_s5 + $0x8] sm:$0xff] }
 0x121   : > { %v1253_v54 = vadd.f32 %v398_v50, %v377_v48  ;;  %v379_v55 = vmul.f32 %v371_v45, %v344_v52  ;;  %v346_v56 = vpop.f32.mrb[7].mxu0 }
 0x122   : > { %v1255_v57 = vadd.f32 %v398_v50, %v378_v51  ;;  %v380_v58 = vmul.f32 %v371_v45, %v346_v56  ;;  %431 = vmax.xlane.f32.xlu0 %v430_v53 }
 0x123   : > { %v1257_v60 = vadd.f32 %v403_v59, %v379_v55 }
 0x124   : > { %v1259_v61 = vadd.f32 %v403_v59, %v380_v58  ;;  %v419_v63 = vadd.f32 %v1255_v57, %v1253_v54  ;;  %v436_v0 = vmax.f32 %v1253_v54, %v1255_v57 }
 0x126   : > { %434 = vmax.xlane.f32.xlu0 %v433_v62  ;;  %420 = vadd.xlane.f32.xlu1 %v419_v63  ;;  %v422_v4 = vadd.f32 %v1259_v61, %v1257_v60  ;;  %v439_v8 = vmax.f32 %v1257_v60, %v1259_v61 }
 0x12a   : > { %437 = vmax.xlane.f32.xlu1 %v436_v0  ;;  %423 = vadd.xlane.f32.xlu0 %v422_v4 }
 0x12e   : > { %440 = vmax.xlane.f32.xlu0 %v439_v8 }
 0x1ab   : > { %v415_v14 = vpop.xlane.xlu0 %414 }
 0x1ac   : > { %v426_v18 = vmul.f32 0.00390625, %v415_v14 }
 0x1ad   : > { %v418_v16 = vpop.xlane.xlu1 %417 }
 0x1ae   : > { %v427_v19 = vmul.f32 0.00390625, %v418_v16 }
 0x1af   : > { %v432_v17 = vpop.xlane.xlu0 %431 }
 0x1b0   : > { %v445_v22 = vsel %vm444_vm2, %v426_v18, %v432_v17 }
 0x1b3   : > { %v435_v20 = vpop.xlane.xlu0 %434  ;;  %v421_v21 = vpop.xlane.xlu1 %420 }
 0x1b4   : > { %v446_v23 = vsel %vm444_vm2, %v427_v19, %v435_v20  ;;  %v428_v27 = vmul.f32 0.00390625, %v421_v21 }
 0x1b5   : > { %v843_v24 = vpack.c.bf16 %v446_v23, %v445_v22 }
 0x1b7   : > { %844 = vmatpush3.bf16.msra.mxu1 %v843_v24  ;;  %v424_v25 = vpop.xlane.xlu0 %423  ;;  %v438_v26 = vpop.xlane.xlu1 %437 }
 0x1b8   : > { %845 = vmatprep.subr.bf16.mxu1 %v1022_v9  ;;  %v429_v28 = vmul.f32 0.00390625, %v424_v25  ;;  %v447_v30 = vsel %vm444_vm2, %v428_v27, %v438_v26 }
 0x1bb   : > { %v441_v29 = vpop.xlane.xlu0 %440 }
 0x1bc   : > { %v448_v31 = vsel %vm444_vm2, %v429_v28, %v441_v29 }
 0x1bd   : > { %v846_v32 = vpack.c.bf16 %v448_v31, %v447_v30 }
 0x1bf   : > { %847 = vmatpush3.bf16.msra.mxu1 %v846_v32 }
 0x1c2   : > { %832 = vmatmul.mubr.msk.f32.vlgmr.msra.gmra.mrb[0].mxu1 %vm289_vm0, %v449_v33 }
 0x1c3   : > { %836 = vmatprep.mubr.msk.f32.mxu1 %vm528_vm3, %v524_v34 }
 0x295   : > { %v519_v35 = vpop.f32.mrb[0].mxu1 }
 0x296   : > { %v523_v37 = vmax.f32 %v519_v35, 0.0  ;;  %v833_v38 = vpop.f32.mrb[1].mxu1 }
 0x298   : > { %834 = vmatprep.subr.msk.mxu1 %vm541_vm4, %v523_v37 }
 0x299   : > { %835 = vmatpush3.msk.msra.mxu1 %vm541_vm4, %v523_v37 }
 0x29a   : > { %837 = vmatmul.mubr.msk.f32.vlgmr.msra.gmra.mrb[2].mxu1 %vm528_vm3, %v525_v39 }
 0x29b   : > { %839 = vmatprep.mubr.msk.f32.mxu1 %vm528_vm3, %v526_v41 }
 0x29e   : > { %840 = vmatmul.mubr.msk.f32.gmra.mrb[4].mxu1 %vm528_vm3, %v527_v44 }
 0x36d   : > { %v838_v45 = vpop.f32.mrb[2].mxu1 }
 0x36e   : > { %v611_v46 = vpop.f32.mrb[3].mxu1  ;;  %v633_v47 = vsel %vm528_vm3, %v838_v45, 0.0 }
 0x36f   : > { %634 = vadd.xlane.f32.xlu0 %v633_v47  ;;  %v630_v48 = vsel %vm528_vm3, %v611_v46, 0.0 }
 0x370   : > { %631 = vadd.xlane.f32.xlu1 %v630_v48 }
 0x371   : > { %v841_v49 = vpop.f32.mrb[4].mxu1 }
 0x372   : > { %v621_v50 = vpop.f32.mrb[5].mxu1  ;;  %v639_v51 = vsel %vm528_vm3, %v841_v49, 0.0 }
 0x373   : > { %640 = vadd.xlane.f32.xlu0 %v639_v51  ;;  %v636_v52 = vsel %vm528_vm3, %v621_v50, 0.0 }
 0x374   : > { %637 = vadd.xlane.f32.xlu1 %v636_v52 }
 0x3fc   : > { %v635_v53 = vpop.xlane.xlu0 %634 }
 0x3fd   : > { %v803_v55 = vmul.f32 -1.442695, %v635_v53  ;;  %v632_v56 = vpop.xlane.xlu1 %631 }
 0x3fe   : > { %v802_v58 = vmul.f32 -1.442695, %v632_v56 }
 0x3ff   : > { %904 = vpow2.f32 %v803_v55 }
 0x400   : > { %906 = vpow2.f32 %v802_v58  ;;  %v641_v59 = vpop.xlane.xlu0 %640 }
 0x401   : > { %v805_v62 = vmul.f32 -1.442695, %v641_v59  ;;  %v638_v63 = vpop.xlane.xlu1 %637 }
 0x402   : > { %v804_v0 = vmul.f32 -1.442695, %v638_v63 }
 0x403   : > { %908 = vpow2.f32 %v805_v62 }
 0x404   : > { %910 = vpow2.f32 %v804_v0 }
 0x409   : > { %v905_v4 = vpop.eup %904 }
 0x40a   : > { %v907_v8 = vpop.eup %906  ;;  %v655_v9 = vadd.f32 1.0, %v905_v4 }
 0x40b   : > { %v654_v12 = vadd.f32 1.0, %v907_v8 }
 0x40c   : > { %912 = vrcp.f32 %v655_v9 }
 0x40d   : > { %v909_v13 = vpop.eup %908  ;;  %914 = vrcp.f32 %v654_v12 }
 0x40e   : > { %v911_v14 = vpop.eup %910  ;;  %v657_v15 = vadd.f32 1.0, %v909_v13 }
 0x40f   : > { %v656_v16 = vadd.f32 1.0, %v911_v14 }
 0x410   : > { %916 = vrcp.f32 %v657_v15 }
 0x411   : > { %918 = vrcp.f32 %v656_v16 }
 0x416   : > { %v913_v17 = vpop.eup %912 }
 0x417   : > { %v915_v18 = vpop.eup %914  ;;  %v668_v19 = vmul.f32 %v913_v17, %v1243_v42  ;;  %v669_v20 = vmul.f32 %v913_v17, %v1245_v43 }
 0x418   : > { %v666_v21 = vmul.f32 %v915_v18, %v1239_v36  ;;  %v667_v22 = vmul.f32 %v915_v18, %v1241_v40 }
 0x419   : > { %v676_v23 = vadd.f32 %v668_v19, %v1185_v5  ;;  %v677_v24 = vadd.f32 %v669_v20, %v1179_v2 }
 0x41a   : > { %v917_v25 = vpop.eup %916  ;;  %v674_v26 = vadd.f32 %v666_v21, %v1181_v3  ;;  %v675_v27 = vadd.f32 %v667_v22, %v1177_v1 }
 0x41b   : > { %v919_v28 = vpop.eup %918  ;;  %v684_v29 = vmax.f32 %v676_v23, 0.0  ;;  %v685_v42 = vmax.f32 %v677_v24, 0.0  ;;  %v672_v43 = vmul.f32 %v917_v25, %v1257_v60  ;;  %v673_v36 = vmul.f32 %v917_v25, %v1259_v61 }
 0x41c   : > { %v682_v30 = vmax.f32 %v674_v26, 0.0  ;;  %v683_v31 = vmax.f32 %v675_v27, 0.0  ;;  %v670_v40 = vmul.f32 %v919_v28, %v1253_v54  ;;  %v671_v5 = vmul.f32 %v919_v28, %v1255_v57 }
 0x41d   : > { %692 = vst [vmem:[%s269_s26 + $0x10] sm:$0xff] %v684_v29  ;;  %693 = vst [vmem:[%s269_s26 + $0x18] sm:$0xff] %v685_v42  ;;  %v680_v1 = vadd.f32 %v672_v43, %v1197_v11  ;;  %v681_v2 = vadd.f32 %v673_v36, %v1189_v7 }
 0x41e   : > { %690 = vst [vmem:[%s269_s26] sm:$0xff] %v682_v30  ;;  %691 = vst [vmem:[%s269_s26 + $0x8] sm:$0xff] %v683_v31  ;;  %v678_v3 = vadd.f32 %v670_v40, %v1195_v10  ;;  %v679_v54 = vadd.f32 %v671_v5, %v1187_v6 }
 0x41f   : > { %v688_v60 = vmax.f32 %v680_v1, 0.0  ;;  %v689_v57 = vmax.f32 %v681_v2, 0.0 }
 0x420   : > { %v686_v7 = vmax.f32 %v678_v3, 0.0  ;;  %v687_v11 = vmax.f32 %v679_v54, 0.0 }
 0x421   : > { %696 = vst [vmem:[%s269_s26 + $0x30] sm:$0xff] %v688_v60  ;;  %697 = vst [vmem:[%s269_s26 + $0x38] sm:$0xff] %v689_v57 }
 0x422   : > { %694 = vst [vmem:[%s269_s26 + $0x20] sm:$0xff] %v686_v7  ;;  %695 = vst [vmem:[%s269_s26 + $0x28] sm:$0xff] %v687_v11 }
 0x423   : > { %963 = shalt.err (!%p960_p2)
}
 0x424   : > { %s964_s20 = scalar_lea.hbm %s1321_s7, 1024  ;;  %s968_s15 = scalar_lea.hbm %s1373_s6, 2048 }
 0x425   : > { %p965_p4 = scmp.ne.s32.totalorder %s1321_s7, %s964_s20  ;;  %p969_p9 = scmp.lt.u32.totalorder %s1321_s7, %s1373_s6 }
 0x426   : > { %p970_p1 = scmp.lt.u32.totalorder %s968_s15, %s964_s20  ;;  %p972_p6 = scmp.lt.u32.totalorder %s964_s20, %s1321_s7 }
 0x427   : > { %p966_p5 = pnand %p965_p4, %p1380_p11 }
 0x428   : > { %p971_p3 = por %p970_p1, %p969_p9 }
 0x429   : > { %p967_p7 = pneg %p966_p5 }
 0x42a   : > { %p973_p12 = por %p972_p6, %p971_p3 }
 0x42c   : > { %p974_p13 = pnand %p973_p12, %p967_p7 }
 0x42e   : > { %977 = shalt.err (!%p974_p13)
}
 0x42f   : > { %s1026_s25 = smov 256   ;;  %s1027_s12 = smov 16  }
 0x430   : > { %850 = dma.vmem_to_hbm [thread:$0]  (%p1380_p11), %s1323_s28, 1024, %s1321_s7, %s699_s13, %s1026_s25, %s1026_s25, %s1027_s12  }
 0x431 PF: > { %s727_s8 = sand.u32 1, %s1004_s21   ;;  %p1381_p8 = scmp.ne.s32.totalorder %s1378_s10, 0 }
 0x432   : > { %p1382_p10 = scmp.ge.s32.totalorder %s1016_s24, 2  ;;  %s728_s16 = scalar_lea.sflag [#allocation4], %s727_s8 }
 0x434   : > { %p857_p0 = pnand %p1382_p10, %p1381_p8 }
 0x436   : > { %999 = dma.done.wait (!%p857_p0), %s728_s16, 1024  }
 0x437   : > { %1001 = vsyncadd (!%p857_p0), %s728_s16, 4294966272  ;;  %p19_p2 = scmp.ge.s32.totalorder %s1088_s27, 4   ;;  %s1383_s21 = smov %s1008_s22 }
 0x438   : > { %s1384_s22 = smov %s1012_s23  ;;  %s1385_s23 = smov %s1100_s30 }
 0x439   : > { %s1386_s24 = smov %s1088_s27  ;;  %21 = sbr.rel (!%p19_p2) target bundleno = 5 (0x5), region = 89 }
 0x440   :  { %733 = vsyncpa [#allocation3], 1 }
 0x441   :  { %735 = vsyncpa [#allocation3 + $0x1], 1 }
 0x442   :  { %736 = vsyncpa [#allocation4], 1 }
 0x443   :  { %738 = vsyncpa [#allocation4 + $0x1], 1 }

</bundles_post_ra>
